<compile_context>
chip_gen: v7x
topology: tpu7x:2x2x1
jax: 0.10.0
libtpu: 0.0.40
codegen_flags: <defaults>
</compile_context>

<pallas_src>
import jax
import jax.numpy as jnp
from jax.experimental import pallas as pl
from jax.experimental.pallas import tpu as pltpu


def _dnn_base_kernel(u_ref, i_ref, wt_ref, b_ref, o_ref):
    # u_ref : [TB, D]  user embeddings for this batch tile (f32 or bf16)
    # i_ref : [TB, D]  item embeddings for this batch tile (f32)
    # wt_ref: [D, D]   Linear weight pre-transposed to [in, out] (pinned)
    # b_ref : [1, D]   Linear bias (pinned)
    # o_ref : [1, TB]  lane-dense per-row dot-product result
    # torch Linear: y = u @ W^T + b  (W already transposed in glue -> plain MXU matmul)
    y = jnp.dot(u_ref[...], wt_ref[...], preferred_element_type=jnp.float32)
    y = y + b_ref[...].astype(jnp.float32)
    prod = y * i_ref[...].astype(jnp.float32)
    # Row-sum -> [TB], written as a lane-dense [1, TB] row (unmasked stores).
    o_ref[...] = jnp.sum(prod, axis=-1).reshape(1, -1)


def _round_up(x, m):
    return (x + m - 1) // m * m


def dnn_base_forward(x, uid_table, iid_table, weight, bias, *, block_b=1024):
    """DNNBase forward. x: int32 [B, 2] of (uid, iid). Returns f32 [B]."""
    B = x.shape[0]
    D = uid_table.shape[1]

    # bf16 MXU operands (f32 accumulation) only once the matmul is non-trivial;
    # at small D the kernel is DMA-bound and f32 is kept for exactness.
    use_bf16 = D >= 256
    u_bytes = 2 if use_bf16 else 4
    w_bytes = 2 if use_bf16 else 4

    # --- batch tile size ----------------------------------------------------
    # Multiple of 128 -> lane-dense output stores; clamped so the
    # double-buffered working set fits comfortably in scoped VMEM everywhere.
    tb = min(max(block_b, 128), _round_up(B, 128))
    tb = _round_up(tb, 128)
    vmem_budget = 24 * 1024 * 1024

    def _working_set(t):
        return (2 * (t * D * u_bytes + t * D * 4)   # double-buffered emb tiles
                + D * D * w_bytes + 2 * D * 4       # pinned weight + bias
                + 2 * t * 4)                        # double-buffered out row

    while _working_set(tb) > vmem_budget and tb > 128:
        tb //= 2

    num_tiles = pl.cdiv(B, tb)
    b_pad = num_tiles * tb

    uid_idx = x[:, 0]
    iid_idx = x[:, 1]
    if b_pad != B:
        pad = b_pad - B
        uid_idx = jnp.pad(uid_idx, (0, pad))   # index 0 is always valid
        iid_idx = jnp.pad(iid_idx, (0, pad))

    # --- glue: embedding gather + one-time layout work ----------------------
    uid_emb = jnp.take(uid_table, uid_idx, axis=0)   # [B_pad, D]
    iid_emb = jnp.take(iid_table, iid_idx, axis=0)   # [B_pad, D]
    w_t = weight.T                                   # [in, out], one-time transpose
    bias2d = bias.reshape(1, D)

    if use_bf16:
        uid_emb = uid_emb.astype(jnp.bfloat16)
        w_t = w_t.astype(jnp.bfloat16)

    bytes_in = (uid_emb.size * uid_emb.dtype.itemsize
                + iid_emb.size * iid_emb.dtype.itemsize
                + w_t.size * w_t.dtype.itemsize
                + bias2d.size * bias2d.dtype.itemsize)
    cost = pl.CostEstimate(
        flops=2 * b_pad * D * D + 3 * b_pad * D,
        transcendentals=0,
        bytes_accessed=bytes_in + b_pad * 4,
    )

    out2d = pl.pallas_call(
        _dnn_base_kernel,
        out_shape=jax.ShapeDtypeStruct((num_tiles, tb), jnp.float32),
        grid_spec=pltpu.PrefetchScalarGridSpec(
            num_scalar_prefetch=0,
            grid=(num_tiles,),
            in_specs=[
                pl.BlockSpec((tb, D), lambda i: (i, 0)),   # uid tile (pipelined)
                pl.BlockSpec((tb, D), lambda i: (i, 0)),   # iid tile (pipelined)
                pl.BlockSpec((D, D), lambda i: (0, 0)),    # weight^T (pinned)
                pl.BlockSpec((1, D), lambda i: (0, 0)),    # bias     (pinned)
            ],
            out_specs=pl.BlockSpec((1, tb), lambda i: (i, 0)),
        ),
        compiler_params=pltpu.CompilerParams(
            dimension_semantics=("parallel",),             # batch tiles independent
            vmem_limit_bytes=32 * 1024 * 1024,
        ),
        cost_estimate=cost,
    )(uid_emb, iid_emb, w_t, bias2d)

    return out2d.reshape(b_pad)[:B]


def reference_forward(x, uid_table, iid_table, weight, bias):
    uid_emb = jnp.take(uid_table, x[:, 0], axis=0)
    iid_emb = jnp.take(iid_table, x[:, 1], axis=0)
    y = uid_emb @ weight.T + bias
    return jnp.sum(y * iid_emb, axis=-1)


if __name__ == "__main__":
    # Small deterministic setup consistent with DNNBase(uid_all, iid_all, emb_dim)
    uid_all, iid_all, emb_dim = 16, 16, 32
    batch = 8

    key = jax.random.PRNGKey(0)
    k1, k2, k3, k4, k5 = jax.random.split(key, 5)

    # Parameters (deterministic random init, torch shapes):
    uid_table = jax.random.normal(k1, (uid_all, emb_dim), dtype=jnp.float32)
    iid_table = jax.random.normal(k2, (iid_all + 1, emb_dim), dtype=jnp.float32)
    weight = jax.random.normal(k3, (emb_dim, emb_dim), dtype=jnp.float32) * 0.1
    bias = jax.random.normal(k4, (emb_dim,), dtype=jnp.float32) * 0.1

    # Input: [B, 2] integer (uid, iid) pairs.
    uid_idx = jax.random.randint(k5, (batch,), 0, uid_all)
    iid_idx = jax.random.randint(jax.random.fold_in(k5, 1), (batch,), 0, iid_all + 1)
    x = jnp.stack([uid_idx, iid_idx], axis=1).astype(jnp.int32)

    fwd = jax.jit(dnn_base_forward)
    out = jax.block_until_ready(fwd(x, uid_table, iid_table, weight, bias))

    ref = reference_forward(x, uid_table, iid_table, weight, bias)
    assert out.shape == (batch,)
    assert jnp.allclose(out, ref, atol=1e-4, rtol=1e-4), (out, ref)

    print("KERNEL_OK")
</pallas_src>

<mosaic_0001>
module attributes {stable_mosaic.version = 11 : i64} {
  func.func @_dnn_base_kernel(%arg0: i32, %arg1: memref<128x32xf32, #tpu.memory_space<vmem>>, %arg2: memref<128x32xf32, #tpu.memory_space<vmem>>, %arg3: memref<32x32xf32, #tpu.memory_space<vmem>>, %arg4: memref<1x32xf32, #tpu.memory_space<vmem>>, %arg5: memref<1x128xf32, #tpu.memory_space<vmem>>) attributes {dimension_semantics = [#tpu.dimension_semantics<parallel>], iteration_bounds = array<i64: 1>, scalar_prefetch = 0 : i64, scratch_operands = 0 : i64, tpu.core_type = #tpu.core_type<tc>, window_params = [{transform_indices = @transform_0, window_bounds = array<i64: 128, 32>}, {transform_indices = @transform_1, window_bounds = array<i64: 128, 32>}, {pipeline_mode = #tpu.pipeline_mode<synchronous>, transform_indices = @transform_2, window_bounds = array<i64: 32, 32>}, {pipeline_mode = #tpu.pipeline_mode<synchronous>, transform_indices = @transform_3, window_bounds = array<i64: 1, 32>}, {transform_indices = @transform_4, window_bounds = array<i64: 1, 128>}]} {
    %c0 = arith.constant 0 : index
    %c0_0 = arith.constant 0 : index
    %0 = vector.load %arg1[%c0, %c0_0] : memref<128x32xf32, #tpu.memory_space<vmem>>, vector<128x32xf32>
    %c0_1 = arith.constant 0 : index
    %c0_2 = arith.constant 0 : index
    %1 = vector.load %arg3[%c0_1, %c0_2] : memref<32x32xf32, #tpu.memory_space<vmem>>, vector<32x32xf32>
    %cst = arith.constant dense<0.000000e+00> : vector<128x32xf32>
    %2 = tpu.matmul %0, %1, %cst {dimension_numbers = #tpu.dot_dimension_numbers<[1], [0], [0], [1], [0, 0, 1, 1], [], []>} : vector<128x32xf32>, vector<32x32xf32>, vector<128x32xf32> -> vector<128x32xf32>
    %c0_3 = arith.constant 0 : index
    %c0_4 = arith.constant 0 : index
    %3 = vector.load %arg4[%c0_3, %c0_4] : memref<1x32xf32, #tpu.memory_space<vmem>>, vector<1x32xf32>
    %4 = vector.broadcast %3 : vector<1x32xf32> to vector<128x32xf32>
    %5 = arith.addf %2, %4 : vector<128x32xf32>
    %c0_5 = arith.constant 0 : index
    %c0_6 = arith.constant 0 : index
    %6 = vector.load %arg2[%c0_5, %c0_6] : memref<128x32xf32, #tpu.memory_space<vmem>>, vector<128x32xf32>
    %7 = arith.mulf %5, %6 : vector<128x32xf32>
    %cst_7 = arith.constant dense<0.000000e+00> : vector<128xf32>
    %8 = vector.multi_reduction <add>, %7, %cst_7 [1] : vector<128x32xf32> to vector<128xf32>
    %9 = vector.shape_cast %8 : vector<128xf32> to vector<1x128xf32>
    %c0_8 = arith.constant 0 : index
    %c0_9 = arith.constant 0 : index
    %10 = vector.load %arg5[%c0_8, %c0_9] : memref<1x128xf32, #tpu.memory_space<vmem>>, vector<1x128xf32>
    tpu.vector_store %arg5[%c0_8, %c0_9], %9 {strides = array<i32>} : memref<1x128xf32, #tpu.memory_space<vmem>>, vector<1x128xf32>,
    return
  }
  func.func @transform_0(%arg0: i32) -> (i32, i32) {
    %c0_i32 = arith.constant 0 : i32
    %c0_i32_0 = arith.constant 0 : i32
    return %arg0, %c0_i32 : i32, i32
  }
  func.func @transform_1(%arg0: i32) -> (i32, i32) {
    %c0_i32 = arith.constant 0 : i32
    %c0_i32_0 = arith.constant 0 : i32
    return %arg0, %c0_i32 : i32, i32
  }
  func.func @transform_2(%arg0: i32) -> (i32, i32) {
    %c0_i32 = arith.constant 0 : i32
    %c0_i32_0 = arith.constant 0 : i32
    %c0_i32_1 = arith.constant 0 : i32
    return %c0_i32, %c0_i32_0 : i32, i32
  }
  func.func @transform_3(%arg0: i32) -> (i32, i32) {
    %c0_i32 = arith.constant 0 : i32
    %c0_i32_0 = arith.constant 0 : i32
    %c0_i32_1 = arith.constant 0 : i32
    return %c0_i32, %c0_i32_0 : i32, i32
  }
  func.func @transform_4(%arg0: i32) -> (i32, i32) {
    %c0_i32 = arith.constant 0 : i32
    %c0_i32_0 = arith.constant 0 : i32
    return %arg0, %c0_i32 : i32, i32
  }
}

</mosaic_0001>

<bundles_post_ra>
// kernel: dnn_base_forward.1
= control target key start
LH: loop header
LB: loop body
LE: loop exit
PB: predicated region body
PF: predicated region fallthrough
CT: control target
= control target key end

     0   :  { %vm44_vm0 = vcmask 261120   ;;  %vm345_vm1 = vcmask 130112   ;;  %vm352_vm2 = vcmask 195712   ;;  %vm359_vm3 = vcmask 261312   ;;  %s745_s2 = inlined_call_operand.vmem [shape: f32[32,32], index: 2, kind: input, shape index: {}]   ;;  %s746_s0 = inlined_call_operand.vmem [shape: f32[128,32], index: 0, kind: input, shape index: {}]   ;;  %s747_s3 = inlined_call_operand.vmem [shape: f32[1,32], index: 3, kind: input, shape index: {}]   ;;  %s748_s1 = inlined_call_operand.vmem [shape: f32[128,32], index: 1, kind: input, shape index: {}]   ;;  %s749_s4 = inlined_call_operand.vmem [shape: f32[1,128], index: 4, kind: output, shape index: {}]  }
   0x1   :  { %v33_v0 = vld [vmem:[%s745_s2] sm:$0xff]  ;;  %v34_v1 = vld [vmem:[%s745_s2 + $0x8] sm:$0xff]  ;;  %v35_v2 = vld [vmem:[%s745_s2 + $0x10] sm:$0xff]  ;;  %vm366_vm4 = vcmask 326912   ;;  %vm373_vm5 = vcmask 392512   ;;  %vm380_vm6 = vcmask 458112  }
   0x2   :  { %v520_v3 = vpack.c.bf16 %v34_v1, %v33_v0  ;;  %v36_v4 = vld [vmem:[%s745_s2 + $0x18] sm:$0xff]  ;;  %v17_v5 = vld [vmem:[%s746_s0] sm:$0xff]  ;;  %v18_v8 = vld [vmem:[%s746_s0 + $0x8] sm:$0xff]  ;;  %vm387_vm7 = vcmask 523712   ;;  %vm394_vm8 = vcmask 589312   ;;  %vm401_vm9 = vcmask 654912  }
   0x3   :  { %v25_v6 = vld [vmem:[%s746_s0 + $0x40] sm:$0xff]  ;;  %v524_v7 = vpack.c.bf16 %v36_v4, %v35_v2  ;;  %496 = vmatprep.mubr.msk.f32.mxu0 %vm44_vm0, %v17_v5  ;;  %v26_v9 = vld [vmem:[%s746_s0 + $0x48] sm:$0xff]  ;;  %v19_v10 = vld [vmem:[%s746_s0 + $0x10] sm:$0xff]  ;;  %vm408_vm10 = vcmask 720512   ;;  %vm415_vm11 = vcmask 786112   ;;  %vm422_vm12 = vcmask 851712  }
   0x4   :  { %508 = vmatprep.mubr.msk.f32.mxu1 %vm44_vm0, %v25_v6  ;;  %521 = vmatprep.subr.bf16.mxu0 %v520_v3  ;;  %v27_v11 = vld [vmem:[%s746_s0 + $0x50] sm:$0xff]  ;;  %v20_v12 = vld [vmem:[%s746_s0 + $0x18] sm:$0xff]  ;;  %v21_v14 = vld [vmem:[%s746_s0 + $0x20] sm:$0xff]  ;;  %vm429_vm13 = vcmask 917312   ;;  %vm436_vm14 = vcmask 982912   ;;  %vm443_vm15 = vcmask 1048512  }
   0x5   :  { %528 = vmatprep.subr.bf16.mxu1 %v520_v3  ;;  %523 = vmatpush3.bf16.msra.mxu0 %v520_v3  ;;  %v28_v13 = vld [vmem:[%s746_s0 + $0x58] sm:$0xff]  ;;  %v29_v15 = vld [vmem:[%s746_s0 + $0x60] sm:$0xff]  ;;  %v22_v16 = vld [vmem:[%s746_s0 + $0x28] sm:$0xff] }
   0x6   :  { %530 = vmatpush3.bf16.msra.mxu1 %v520_v3  ;;  %525 = vmatprep.subr.bf16.mxu0 %v524_v7  ;;  %v30_v17 = vld [vmem:[%s746_s0 + $0x68] sm:$0xff]  ;;  %v23_v18 = vld [vmem:[%s746_s0 + $0x30] sm:$0xff]  ;;  %v24_v20 = vld [vmem:[%s746_s0 + $0x38] sm:$0xff] }
   0x7   :  { %529 = vmatprep.subr.bf16.mxu1 %v524_v7  ;;  %v31_v19 = vld [vmem:[%s746_s0 + $0x70] sm:$0xff]  ;;  %v32_v21 = vld [vmem:[%s746_s0 + $0x78] sm:$0xff]  ;;  %v636_v22 = vld [vmem:[%s747_s3] ss:$0 sm:$0xff] }
   0x8   :  { %v247_v25 = vld [vmem:[%s748_s1 + $0x48] sm:$0xff]  ;;  %v238_v31 = vld [vmem:[%s748_s1] sm:$0xff]  ;;  %v241_v38 = vld [vmem:[%s748_s1 + $0x18] sm:$0xff] }
   0x9   :  { %527 = vmatpush3.bf16.msra.mxu0 %v524_v7  ;;  %v239_v26 = vld [vmem:[%s748_s1 + $0x8] sm:$0xff]  ;;  %v249_v40 = vld [vmem:[%s748_s1 + $0x58] sm:$0xff]  ;;  %v246_v47 = vld [vmem:[%s748_s1 + $0x40] sm:$0xff] }
   0xa   :  { %531 = vmatpush3.bf16.msra.mxu1 %v524_v7  ;;  %v240_v59 = vld [vmem:[%s748_s1 + $0x10] sm:$0xff]  ;;  %v243_v1 = vld [vmem:[%s748_s1 + $0x28] sm:$0xff]  ;;  %v242_v2 = vld [vmem:[%s748_s1 + $0x20] sm:$0xff] }
   0xb   :  { %v248_v60 = vld [vmem:[%s748_s1 + $0x50] sm:$0xff] }
   0xc   :  { %497 = vmatmul.mubr.msk.f32.vlgmr.msra.gmra.mrb[0].mxu0 %vm44_vm0, %v18_v8 }
   0xd   :  { %509 = vmatmul.mubr.msk.f32.vlgmr.msra.gmra.mrb[0].mxu1 %vm44_vm0, %v26_v9  ;;  %499 = vmatprep.mubr.msk.f32.mxu0 %vm44_vm0, %v19_v10 }
   0xe   :  { %511 = vmatprep.mubr.msk.f32.mxu1 %vm44_vm0, %v27_v11 }
  0x10   :  { %500 = vmatmul.mubr.msk.f32.gmra.mrb[2].mxu0 %vm44_vm0, %v20_v12 }
  0x11   :  { %512 = vmatmul.mubr.msk.f32.gmra.mrb[2].mxu1 %vm44_vm0, %v28_v13  ;;  %502 = vmatprep.mubr.msk.f32.mxu0 %vm44_vm0, %v21_v14  ;;  %v245_v13 = vld [vmem:[%s748_s1 + $0x38] sm:$0xff]  ;;  %v244_v14 = vld [vmem:[%s748_s1 + $0x30] sm:$0xff] }
  0x12   :  { %514 = vmatprep.mubr.msk.f32.mxu1 %vm44_vm0, %v29_v15 }
  0x14   :  { %503 = vmatmul.mubr.msk.f32.gmra.mrb[4].mxu0 %vm44_vm0, %v22_v16 }
  0x15   :  { %515 = vmatmul.mubr.msk.f32.gmra.mrb[4].mxu1 %vm44_vm0, %v30_v17  ;;  %505 = vmatprep.mubr.msk.f32.mxu0 %vm44_vm0, %v23_v18 }
  0x16   :  { %517 = vmatprep.mubr.msk.f32.mxu1 %vm44_vm0, %v31_v19 }
  0x18   :  { %506 = vmatmul.mubr.msk.f32.gmra.mrb[6].mxu0 %vm44_vm0, %v24_v20 }
  0x19   :  { %518 = vmatmul.mubr.msk.f32.gmra.mrb[6].mxu1 %vm44_vm0, %v32_v21 }
  0xdf   :  { %v498_v23 = vpop.f32.mrb[0].mxu0 }
  0xe0   :  { %v510_v24 = vpop.f32.mrb[0].mxu1  ;;  %v165_v27 = vadd.f32 %v498_v23, %v636_v22  ;;  %v159_v29 = vpop.f32.mrb[1].mxu0 }
  0xe1   :  { %v205_v28 = vadd.f32 %v510_v24, %v636_v22  ;;  %v199_v30 = vpop.f32.mrb[1].mxu1  ;;  %v160_v32 = vadd.f32 %v636_v22, %v159_v29  ;;  %v251_v24 = vld [vmem:[%s748_s1 + $0x68] sm:$0xff] }
  0xe2   :  { %v255_v34 = vmul.f32 %v239_v26, %v165_v27  ;;  %v200_v35 = vadd.f32 %v636_v22, %v199_v30 }
  0xe3   :  { %v263_v33 = vmul.f32 %v247_v25, %v205_v28  ;;  %v501_v36 = vpop.f32.mrb[2].mxu0  ;;  %v254_v39 = vmul.f32 %v238_v31, %v160_v32  ;;  %v250_v25 = vld [vmem:[%s748_s1 + $0x60] sm:$0xff]  ;;  %v253_v32 = vld [vmem:[%s748_s1 + $0x78] sm:$0xff] }
  0xe4   :  { %v513_v37 = vpop.f32.mrb[2].mxu1  ;;  %v175_v41 = vadd.f32 %v501_v36, %v636_v22  ;;  %v169_v42 = vpop.f32.mrb[3].mxu0  ;;  %v273_v44 = vsel %vm44_vm0, %v255_v34, 0.0  ;;  %v262_v51 = vmul.f32 %v246_v47, %v200_v35 }
  0xe5   :  { %v297_v43 = vsel %vm44_vm0, %v263_v33, 0.0  ;;  %v215_v45 = vadd.f32 %v513_v37, %v636_v22  ;;  %v209_v46 = vpop.f32.mrb[3].mxu1  ;;  %274 = vadd.xlane.f32.xlu0 %v273_v44  ;;  %v170_v53 = vadd.f32 %v636_v22, %v169_v42  ;;  %v270_v56 = vsel %vm44_vm0, %v254_v39, 0.0  ;;  %v252_v33 = vld [vmem:[%s748_s1 + $0x70] sm:$0xff] }
  0xe6   :  { %298 = vadd.xlane.f32.xlu1 %v297_v43  ;;  %v257_v48 = vmul.f32 %v241_v38, %v175_v41  ;;  %v210_v54 = vadd.f32 %v636_v22, %v209_v46  ;;  %v294_v4 = vsel %vm44_vm0, %v262_v51, 0.0  ;;  %v334_v39 = vlaneseq }
  0xe7   :  { %v265_v49 = vmul.f32 %v249_v40, %v215_v45  ;;  %v504_v50 = vpop.f32.mrb[4].mxu0  ;;  %v256_v5 = vmul.f32 %v240_v59, %v170_v53 }
  0xe8   :  { %v516_v52 = vpop.f32.mrb[4].mxu1  ;;  %v279_v55 = vsel %vm44_vm0, %v257_v48, 0.0  ;;  %v179_v57 = vpop.f32.mrb[5].mxu0  ;;  %v185_v62 = vadd.f32 %v504_v50, %v636_v22  ;;  %v264_v6 = vmul.f32 %v248_v60, %v210_v54  ;;  %v335_v40 = vand.u32 127, %v334_v39 }
  0xe9   :  { %v219_v58 = vpop.f32.mrb[5].mxu1  ;;  %271 = vadd.xlane.f32.xlu0 %v270_v56  ;;  %v303_v61 = vsel %vm44_vm0, %v265_v49, 0.0  ;;  %v180_v63 = vadd.f32 %v636_v22, %v179_v57  ;;  %v276_v15 = vsel %vm44_vm0, %v256_v5, 0.0  ;;  %v225_v17 = vadd.f32 %v516_v52, %v636_v22 }
  0xea   :  { %280 = vadd.xlane.f32.xlu1 %v279_v55  ;;  %v259_v11 = vmul.f32 %v243_v1, %v185_v62  ;;  %v300_v16 = vsel %vm44_vm0, %v264_v6, 0.0  ;;  %v220_v18 = vadd.f32 %v636_v22, %v219_v58  ;;  %v720_v43 = vshrl.u32 %v334_v39, 7 }
  0xeb   :  { %v507_v0 = vpop.f32.mrb[6].mxu0  ;;  %v258_v12 = vmul.f32 %v242_v2, %v180_v63  ;;  %v267_v26 = vmul.f32 %v251_v24, %v225_v17  ;;  %v340_v44 = vadd.s32 4294967288, %v335_v40  ;;  %v347_v47 = vadd.s32 4294967280, %v335_v40 }
  0xec   :  { %v519_v3 = vpop.f32.mrb[6].mxu1  ;;  %v189_v7 = vpop.f32.mrb[7].mxu0  ;;  %v195_v9 = vadd.f32 %v507_v0, %v636_v22  ;;  %v285_v19 = vsel %vm44_vm0, %v259_v11, 0.0  ;;  %v266_v27 = vmul.f32 %v250_v25, %v220_v18  ;;  %v338_v48 = vsub.s32 %v335_v40, %v720_v43 }
  0xed   :  { %v229_v8 = vpop.f32.mrb[7].mxu1  ;;  %295 = vadd.xlane.f32.xlu0 %v294_v4  ;;  %v190_v10 = vadd.f32 %v636_v22, %v189_v7  ;;  %v282_v20 = vsel %vm44_vm0, %v258_v12, 0.0  ;;  %v235_v28 = vadd.f32 %v519_v3, %v636_v22  ;;  %v309_v34 = vsel %vm44_vm0, %v267_v26, 0.0 }
  0xee   :  { %304 = vadd.xlane.f32.xlu1 %v303_v61  ;;  %v261_v21 = vmul.f32 %v245_v13, %v195_v9  ;;  %v230_v31 = vadd.f32 %v636_v22, %v229_v8  ;;  %v306_v35 = vsel %vm44_vm0, %v266_v27, 0.0  ;;  %v343_v49 = vsub.s32 %v340_v44, %v720_v43 }
  0xef   :  { %v260_v23 = vmul.f32 %v244_v14, %v190_v10  ;;  %v269_v36 = vmul.f32 %v253_v32, %v235_v28  ;;  %v354_v50 = vadd.s32 4294967272, %v335_v40  ;;  %v350_v53 = vsub.s32 %v347_v47, %v720_v43 }
  0xf0   :  { %v291_v29 = vsel %vm44_vm0, %v261_v21, 0.0  ;;  %v268_v37 = vmul.f32 %v252_v33, %v230_v31  ;;  %v361_v54 = vadd.s32 4294967264, %v335_v40  ;;  %v368_v56 = vadd.s32 4294967256, %v335_v40 }
  0xf1   :  { %301 = vadd.xlane.f32.xlu0 %v300_v16  ;;  %v288_v30 = vsel %vm44_vm0, %v260_v23, 0.0  ;;  %v315_v22 = vsel %vm44_vm0, %v269_v36, 0.0  ;;  %v357_v58 = vsub.s32 %v354_v50, %v720_v43  ;;  %v382_v63 = vadd.s32 4294967240, %v335_v40 }
  0xf2   :  { %277 = vadd.xlane.f32.xlu1 %v276_v15  ;;  %v312_v38 = vsel %vm44_vm0, %v268_v37, 0.0  ;;  %v364_v62 = vsub.s32 %v361_v54, %v720_v43  ;;  %v375_v0 = vadd.s32 4294967248, %v335_v40  ;;  %v371_v2 = vsub.s32 %v368_v56, %v720_v43 }
  0xf3   :  { %v389_v3 = vadd.s32 4294967232, %v335_v40  ;;  %v396_v5 = vadd.s32 4294967224, %v335_v40  ;;  %v403_v7 = vadd.s32 4294967216, %v335_v40  ;;  %v385_v11 = vsub.s32 %v382_v63, %v720_v43 }
  0xf4   :  { %v378_v12 = vsub.s32 %v375_v0, %v720_v43  ;;  %v410_v13 = vadd.s32 4294967208, %v335_v40  ;;  %v424_v16 = vadd.s32 4294967192, %v335_v40  ;;  %v438_v27 = vadd.s32 4294967176, %v335_v40 }
  0xf5   :  { %283 = vadd.xlane.f32.xlu0 %v282_v20  ;;  %v392_v17 = vsub.s32 %v389_v3, %v720_v43  ;;  %v399_v20 = vsub.s32 %v396_v5, %v720_v43  ;;  %v406_v21 = vsub.s32 %v403_v7, %v720_v43  ;;  %v431_v28 = vadd.s32 4294967184, %v335_v40 }
  0xf6   :  { %286 = vadd.xlane.f32.xlu1 %v285_v19  ;;  %v417_v19 = vadd.s32 4294967200, %v335_v40  ;;  %v427_v31 = vsub.s32 %v424_v16, %v720_v43  ;;  %v441_v40 = vsub.s32 %v438_v27, %v720_v43 }
  0xf9   :  { %289 = vadd.xlane.f32.xlu0 %v288_v30 }
  0xfa   :  { %292 = vadd.xlane.f32.xlu1 %v291_v29  ;;  %v413_v29 = vsub.s32 %v410_v13, %v720_v43 }
  0xfd   :  { %307 = vadd.xlane.f32.xlu0 %v306_v35 }
  0xfe   :  { %310 = vadd.xlane.f32.xlu1 %v309_v34  ;;  %v420_v34 = vsub.s32 %v417_v19, %v720_v43 }
 0x101   :  { %313 = vadd.xlane.f32.xlu0 %v312_v38 }
 0x102   :  { %316 = vadd.xlane.f32.xlu1 %v315_v22 }
 0x172   :  { %v275_v42 = vpop.xlane.xlu0 %274 }
 0x173   :  { %v718_v41 = vpop.xlane.xlu1 %298  ;;  %v344_v57 = vrot.slane %v275_v42, %v343_v49  ;;  %v434_v42 = vsub.s32 %v431_v28, %v720_v43 }
 0x174   :  { %v400_v35 = vrot.slane %v718_v41, %v399_v20 }
 0x176   :  { %v272_v46 = vpop.xlane.xlu0 %271 }
 0x177   :  { %v281_v45 = vpop.xlane.xlu1 %280  ;;  %v339_v55 = vrot.slane %v272_v46, %v338_v48 }
 0x178   :  { %v358_v6 = vrot.slane %v281_v45, %v357_v58 }
 0x179   :  { %v346_v1 = vsel %vm345_vm1, %v344_v57, %v339_v55 }
 0x17a   :  { %v296_v52 = vpop.xlane.xlu0 %295 }
 0x17b   :  { %v724_v51 = vpop.xlane.xlu1 %304  ;;  %v393_v32 = vrot.slane %v296_v52, %v392_v17 }
 0x17c   :  { %v414_v44 = vrot.slane %v724_v51, %v413_v29 }
 0x17e   :  { %v302_v60 = vpop.xlane.xlu0 %301 }
 0x17f   :  { %v278_v59 = vpop.xlane.xlu1 %277  ;;  %v407_v38 = vrot.slane %v302_v60, %v406_v21 }
 0x180   :  { %v351_v61 = vrot.slane %v278_v59, %v350_v53 }
 0x182   :  { %v353_v4 = vsel %vm352_vm2, %v351_v61, %v346_v1  ;;  %v284_v9 = vpop.xlane.xlu0 %283 }
 0x183   :  { %v287_v8 = vpop.xlane.xlu1 %286  ;;  %v365_v10 = vrot.slane %v284_v9, %v364_v62  ;;  %v360_v15 = vsel %vm359_vm3, %v358_v6, %v353_v4 }
 0x184   :  { %v372_v14 = vrot.slane %v287_v8, %v371_v2 }
 0x185   :  { %v367_v18 = vsel %vm366_vm4, %v365_v10, %v360_v15 }
 0x186   :  { %v290_v24 = vpop.xlane.xlu0 %289  ;;  %v374_v30 = vsel %vm373_vm5, %v372_v14, %v367_v18 }
 0x187   :  { %v293_v23 = vpop.xlane.xlu1 %292  ;;  %v379_v26 = vrot.slane %v290_v24, %v378_v12 }
 0x188   :  { %v386_v25 = vrot.slane %v293_v23, %v385_v11 }
 0x189   :  { %v381_v33 = vsel %vm380_vm6, %v379_v26, %v374_v30 }
 0x18a   :  { %v388_v36 = vsel %vm387_vm7, %v386_v25, %v381_v33  ;;  %v308_v22 = vpop.xlane.xlu0 %307 }
 0x18b   :  { %v311_v37 = vpop.xlane.xlu1 %310  ;;  %v395_v39 = vsel %vm394_vm8, %v393_v32, %v388_v36  ;;  %v421_v47 = vrot.slane %v308_v22, %v420_v34 }
 0x18c   :  { %v402_v45 = vsel %vm401_vm9, %v400_v35, %v395_v39  ;;  %v428_v48 = vrot.slane %v311_v37, %v427_v31 }
 0x18d   :  { %v409_v46 = vsel %vm408_vm10, %v407_v38, %v402_v45 }
 0x18e   :  { %v416_v41 = vsel %vm415_vm11, %v414_v44, %v409_v46  ;;  %v314_v50 = vpop.xlane.xlu0 %313 }
 0x18f   :  { %v317_v49 = vpop.xlane.xlu1 %316  ;;  %v423_v52 = vsel %vm422_vm12, %v421_v47, %v416_v41  ;;  %v435_v54 = vrot.slane %v314_v50, %v434_v42 }
 0x190   :  { %v442_v53 = vrot.slane %v317_v49, %v441_v40  ;;  %v430_v55 = vsel %vm429_vm13, %v428_v48, %v423_v52 }
 0x191   :  { %v437_v56 = vsel %vm436_vm14, %v435_v54, %v430_v55 }
 0x192   :  { %v444_v57 = vsel %vm443_vm15, %v442_v53, %v437_v56 }
 0x193   :  { %446 = vst [vmem:[%s749_s4] sm:$0x1] %v444_v57 }

</bundles_post_ra>
